<compile_context>
chip_gen: v5e
topology: v5e:2x2
jax: 0.10.0
libtpu: 0.0.40
codegen_flags: <defaults>
</compile_context>

<pallas_src>
import jax
import jax.numpy as jnp
from jax.experimental import pallas as pl
from jax.experimental.pallas import tpu as pltpu


_LANE = 128
_MAX_TILE = 4096          # per-step VMEM at this size is < 1 MB -> huge headroom even on v7x
_SELECT_CHAIN_MAX = 32    # table columns <= this -> VPU select chain, else MXU one-hot
_ONEHOT_K_CHUNK = 512     # K-block the one-hot gather to bound the (chunk, TB) intermediate


def _round_up(x, m):
    return (x + m - 1) // m * m


def _gather_cols(table, ids_row):
    """Gather columns of `table` (W, N) at `ids_row` (1, TB) -> (W, TB) float32.

    Column b of the result is table[:, ids_row[0, b]].  Ids outside [0, N) produce
    zero columns (bounds-safe; never reads OOB VMEM).
    """
    W, N = table.shape
    TB = ids_row.shape[-1]
    if N <= _SELECT_CHAIN_MAX:
        # Small table: unrolled VPU select chain (no MXU, no cross-lane traffic).
        out = jnp.zeros((W, TB), jnp.float32)
        for n in range(N):
            out = jnp.where(ids_row == n, table[:, n:n + 1], out)
        return out
    # Large table: one-hot gather on the MXU, K-chunked so the intermediate is at most
    # (_ONEHOT_K_CHUNK, TB) f32 instead of a full (N, TB) slab.
    acc = jnp.zeros((W, TB), jnp.float32)
    for n0 in range(0, N, _ONEHOT_K_CHUNK):
        nc = min(_ONEHOT_K_CHUNK, N - n0)
        iota = jax.lax.broadcasted_iota(jnp.int32, (nc, TB), 0) + n0
        onehot = (iota == ids_row).astype(jnp.float32)               # (nc, TB)
        acc = acc + jnp.dot(table[:, n0:n0 + nc], onehot,
                            preferred_element_type=jnp.float32)
    return acc


def _lookup_kernel(idx_ref, table_ref, out_ref):
    # Pre-composed path: one gather of the fused (pose | proj | pad) table by image_idx.
    # idx_ref   : (1, TB)   int32
    # table_ref : (R, F*C)  f32   VMEM-resident
    # out_ref   : (R, TB)   f32
    out_ref[...] = _gather_cols(table_ref[...], idx_ref[...])


def _compose_kernel(ids_ref, rig_ref, camproj_ref, out_ref):
    # ids_ref     : (2, TB) int32   row 0 = frame id, row 1 = camera id
    # rig_ref     : (16, F) f32     rig_t_world, 4x4 row-major flattened, transposed
    # camproj_ref : (R, C)  f32     rows 0:16 camera_t_rig, rows 16:16+P projection, rest 0
    # out_ref     : (R, TB) f32     rows 0:16 camera_t_world, rows 16:16+P projection
    fid = ids_ref[0:1, :]
    cid = ids_ref[1:2, :]
    rig_g = _gather_cols(rig_ref[...], fid)         # (16, TB) = rig_t_world[fid].T
    cp_g = _gather_cols(camproj_ref[...], cid)      # (R, TB)  fused camera+proj gather

    # pose[b, i, j] = sum_k cam[b, i, k] * rig[b, k, j]; output row 4*i + j.
    # 4-row blocks are stored directly (no concatenate / 16xTB intermediate).
    for i in range(4):
        acc = cp_g[4 * i:4 * i + 1, :] * rig_g[0:4, :]               # k = 0
        for k in range(1, 4):
            acc = acc + cp_g[4 * i + k:4 * i + k + 1, :] * rig_g[4 * k:4 * k + 4, :]
        out_ref[4 * i:4 * (i + 1), :] = acc
    # Projection rows (plus zero pad rows): one 8-sublane-aligned store.
    if out_ref.shape[0] > 16:
        out_ref[16:, :] = cp_g[16:, :]


def _pick_tile(bp):
    """Largest tile <= _MAX_TILE dividing bp, keeping >= 2 grid steps whenever
    bp >= 256 so ("parallel",) can shard across both v7x TensorCores.  For
    bp < 256 a single tile is emitted (work is negligible there)."""
    if bp < 256:
        return bp
    for cand in (4096, 2048, 1024, 512, 256, 128):
        if cand <= _MAX_TILE and bp % cand == 0 and bp // cand >= 2:
            return cand
    return _LANE


def _xla_forward(image_idx, rig_t_world, camera_t_rig, projection):
    """Plain-XLA reference (and optional small-batch fallback)."""
    idx = image_idx.astype(jnp.int32)
    C = camera_t_rig.shape[0]
    fid = idx // C
    cid = idx % C
    pose = jnp.einsum('bij,bjk->bik',
                      camera_t_rig.astype(jnp.float32)[cid],
                      rig_t_world.astype(jnp.float32)[fid])
    return pose, projection.astype(jnp.float32)[cid]


def camera_rig_table_forward(image_idx, rig_t_world, camera_t_rig, projection,
                             *, precompose_max=64, min_pallas_batch=0):
    """Pallas implementation of CameraRigTable.forward.

    Args:
      image_idx:    (B,) int, values in [0, num_frames * num_cameras)
      rig_t_world:  (F, 4, 4) float
      camera_t_rig: (C, 4, 4) float
      projection:   (C, P) float
      precompose_max: if F * C <= this, pre-compose the full pose table in XLA and
        run a single in-kernel gather.
      min_pallas_batch: batches smaller than this use the plain-XLA path (pad-to-128
        plus pallas_call overhead is not worth it for tiny B); default 0 so the
        Pallas kernel always runs.
    Returns:
      (camera_t_world (B, 4, 4) float32, proj (B, P) float32)
    """
    assert image_idx.ndim == 1
    F = rig_t_world.shape[0]
    C = camera_t_rig.shape[0]
    P = projection.shape[-1]
    B = image_idx.shape[0]

    if B < min_pallas_batch:
        return _xla_forward(image_idx, rig_t_world, camera_t_rig, projection)

    idx = image_idx.astype(jnp.int32)        # module guarantees non-negative, in-range ids
    fid = idx // C
    cid = idx % C

    rig_f = rig_t_world.astype(jnp.float32)
    cam_f = camera_t_rig.astype(jnp.float32)
    proj_f = projection.astype(jnp.float32)

    # Single fused output slab: rows 0:16 pose, 16:16+P projection, rest zero padding,
    # rounded to a multiple of 8 sublanes -> unmasked stores, one output DMA stream.
    R = _round_up(16 + P, 8)

    # Pad the batch to a lane-dense multiple of 128 and pick the tile / grid.
    Bp = max(_LANE, _round_up(B, _LANE))
    TB = _pick_tile(Bp)
    pad = Bp - B                                  # padded entries gather id 0 (thrown away)

    precompose = (F * C) <= precompose_max
    if precompose:
        # Compose the whole (frame, camera) pose table with a tiny XLA einsum; the kernel
        # becomes a single gather of the fused (pose | proj | pad) table by image_idx.
        pose_tab = jnp.einsum('cij,fjk->fcik', cam_f, rig_f).reshape(F * C, 16)
        proj_tab = jnp.tile(proj_f, (F, 1))                       # row f*C + c = proj[c]
        table = jnp.concatenate(
            [pose_tab, proj_tab, jnp.zeros((F * C, R - 16 - P), jnp.float32)],
            axis=1).T                                             # (R, F*C)
        ids = jnp.pad(idx, (0, pad))[None, :]                     # (1, Bp)
        kernel = _lookup_kernel
        in_specs = [
            pl.BlockSpec((1, TB), lambda t: (0, t)),              # image ids per tile
            pl.BlockSpec((R, F * C), lambda t: (0, 0)),           # fused table, VMEM-resident
        ]
        operands = (ids, table)
        flops = 0
        table_bytes = 4 * R * F * C
    else:
        rig_tab = rig_f.reshape(F, 16).T                          # (16, F)
        camproj_tab = jnp.concatenate(
            [cam_f.reshape(C, 16), proj_f, jnp.zeros((C, R - 16 - P), jnp.float32)],
            axis=1).T                                             # (R, C)
        ids = jnp.stack([jnp.pad(fid, (0, pad)),
                         jnp.pad(cid, (0, pad))])                 # (2, Bp), one DMA stream
        kernel = _compose_kernel
        in_specs = [
            pl.BlockSpec((2, TB), lambda t: (0, t)),              # stacked frame/camera ids
            pl.BlockSpec((16, F), lambda t: (0, 0)),              # rig table, VMEM-resident
            pl.BlockSpec((R, C), lambda t: (0, 0)),               # fused cam+proj table
        ]
        operands = (ids, rig_tab, camproj_tab)
        flops = 2 * 64 * Bp                                       # 4x4 compose mul-adds
        table_bytes = 4 * (16 * F + R * C)

    cost = pl.CostEstimate(
        flops=flops, transcendentals=0,
        bytes_accessed=table_bytes + 4 * 2 * Bp + 4 * R * Bp)

    out = pl.pallas_call(
        kernel,
        out_shape=jax.ShapeDtypeStruct((R, Bp), jnp.float32),
        grid_spec=pltpu.PrefetchScalarGridSpec(
            num_scalar_prefetch=0,
            grid=(Bp // TB,),
            in_specs=in_specs,
            out_specs=pl.BlockSpec((R, TB), lambda t: (0, t)),    # lane-dense output slab
        ),
        compiler_params=pltpu.CompilerParams(
            dimension_semantics=("parallel",)),
        cost_estimate=cost,
    )(*operands)

    # Layout plumbing back to module layout: one transpose, then sliced views.
    # (Consumers that accept the (R, B) lane-major layout can take `out` directly.)
    out_t = out.T[:B]                              # (B, R)
    pose = out_t[:, :16].reshape(B, 4, 4)
    proj = out_t[:, 16:16 + P]
    return pose, proj


def _make_poses(key, n):
    """Deterministic valid-looking homogeneous transforms [n, 4, 4]."""
    k1, k2 = jax.random.split(key)
    rot = jax.random.normal(k1, (n, 3, 3), dtype=jnp.float32) * 0.1 + jnp.eye(3)
    t = jax.random.normal(k2, (n, 3, 1), dtype=jnp.float32)
    top = jnp.concatenate([rot, t], axis=-1)                       # (n, 3, 4)
    bottom = jnp.broadcast_to(
        jnp.array([[0.0, 0.0, 0.0, 1.0]], jnp.float32), (n, 1, 4))
    return jnp.concatenate([top, bottom], axis=1)                  # (n, 4, 4)


if __name__ == "__main__":
    key = jax.random.PRNGKey(0)

    def check(num_frames, num_cameras, P, B, **kwargs):
        k_rig, k_cam, k_proj, k_idx = jax.random.split(
            jax.random.fold_in(key, num_frames * 1000 + num_cameras), 4)
        rig_t_world = _make_poses(k_rig, num_frames)               # (F, 4, 4)
        camera_t_rig = _make_poses(k_cam, num_cameras)             # (C, 4, 4)
        projection = jax.random.uniform(
            k_proj, (num_cameras, P), dtype=jnp.float32, minval=0.5, maxval=2.0)
        num_images = num_frames * num_cameras
        image_idx = jax.random.randint(k_idx, (B,), 0, num_images, dtype=jnp.int32)

        pose, proj = camera_rig_table_forward(
            image_idx, rig_t_world, camera_t_rig, projection, **kwargs)
        pose, proj = jax.block_until_ready((pose, proj))

        ref_pose, ref_proj = _xla_forward(image_idx, rig_t_world, camera_t_rig, projection)
        assert pose.shape == (B, 4, 4) and pose.dtype == jnp.float32
        assert proj.shape == (B, P) and proj.dtype == jnp.float32
        assert jnp.allclose(pose, ref_pose, atol=1e-5)
        assert jnp.allclose(proj, ref_proj, atol=1e-6)

    # Small rig -> pre-composed single-gather path (F*C <= 64), single tile.
    check(num_frames=6, num_cameras=4, P=4, B=8)
    # Same small data forced through the general split-gather + in-kernel compose path.
    check(num_frames=6, num_cameras=4, P=4, B=8, precompose_max=0)
    # Larger frame table -> K-chunked one-hot MXU gather, multi-tile grid, batch padding.
    check(num_frames=40, num_cameras=3, P=4, B=300)

    print("KERNEL_OK")
</pallas_src>

<mosaic_0001>
module attributes {stable_mosaic.version = 11 : i64} {
  func.func @_lookup_kernel(%arg0: i32, %arg1: memref<1x128xi32, #tpu.memory_space<vmem>>, %arg2: memref<24x24xf32, #tpu.memory_space<vmem>>, %arg3: memref<24x128xf32, #tpu.memory_space<vmem>>) attributes {dimension_semantics = [#tpu.dimension_semantics<parallel>], iteration_bounds = array<i64: 1>, scalar_prefetch = 0 : i64, scratch_operands = 0 : i64, tpu.core_type = #tpu.core_type<tc>, window_params = [{transform_indices = @transform_0, window_bounds = array<i64: 1, 128>}, {pipeline_mode = #tpu.pipeline_mode<synchronous>, transform_indices = @transform_1, window_bounds = array<i64: 24, 24>}, {transform_indices = @transform_2, window_bounds = array<i64: 24, 128>}]} {
    %c0 = arith.constant 0 : index
    %c0_0 = arith.constant 0 : index
    %0 = vector.load %arg2[%c0, %c0_0] : memref<24x24xf32, #tpu.memory_space<vmem>>, vector<24x24xf32>
    %c0_1 = arith.constant 0 : index
    %c0_2 = arith.constant 0 : index
    %1 = vector.load %arg1[%c0_1, %c0_2] : memref<1x128xi32, #tpu.memory_space<vmem>>, vector<1x128xi32>
    %cst = arith.constant 0.000000e+00 : f32
    %2 = vector.broadcast %cst : f32 to vector<24x128xf32>
    %c0_i32 = arith.constant 0 : i32
    %3 = vector.broadcast %c0_i32 : i32 to vector<1x128xi32>
    %4 = arith.cmpi eq, %1, %3 : vector<1x128xi32>
    %5 = vector.extract_strided_slice %0 {offsets = [0, 0], sizes = [24, 1], strides = [1, 1]} : vector<24x24xf32> to vector<24x1xf32>
    %6 = vector.shape_cast %4 : vector<1x128xi1> to vector<1x128xi1>
    %7 = vector.broadcast %6 : vector<1x128xi1> to vector<24x128xi1>
    %8 = vector.shape_cast %5 : vector<24x1xf32> to vector<24x1xf32>
    %9 = vector.broadcast %8 : vector<24x1xf32> to vector<24x128xf32>
    %10 = arith.select %7, %9, %2 : vector<24x128xi1>, vector<24x128xf32>
    %c1_i32 = arith.constant 1 : i32
    %11 = vector.broadcast %c1_i32 : i32 to vector<1x128xi32>
    %12 = arith.cmpi eq, %1, %11 : vector<1x128xi32>
    %13 = vector.extract_strided_slice %0 {offsets = [0, 1], sizes = [24, 1], strides = [1, 1]} : vector<24x24xf32> to vector<24x1xf32>
    %14 = vector.shape_cast %12 : vector<1x128xi1> to vector<1x128xi1>
    %15 = vector.broadcast %14 : vector<1x128xi1> to vector<24x128xi1>
    %16 = vector.shape_cast %13 : vector<24x1xf32> to vector<24x1xf32>
    %17 = vector.broadcast %16 : vector<24x1xf32> to vector<24x128xf32>
    %18 = arith.select %15, %17, %10 : vector<24x128xi1>, vector<24x128xf32>
    %c2_i32 = arith.constant 2 : i32
    %19 = vector.broadcast %c2_i32 : i32 to vector<1x128xi32>
    %20 = arith.cmpi eq, %1, %19 : vector<1x128xi32>
    %21 = vector.extract_strided_slice %0 {offsets = [0, 2], sizes = [24, 1], strides = [1, 1]} : vector<24x24xf32> to vector<24x1xf32>
    %22 = vector.shape_cast %20 : vector<1x128xi1> to vector<1x128xi1>
    %23 = vector.broadcast %22 : vector<1x128xi1> to vector<24x128xi1>
    %24 = vector.shape_cast %21 : vector<24x1xf32> to vector<24x1xf32>
    %25 = vector.broadcast %24 : vector<24x1xf32> to vector<24x128xf32>
    %26 = arith.select %23, %25, %18 : vector<24x128xi1>, vector<24x128xf32>
    %c3_i32 = arith.constant 3 : i32
    %27 = vector.broadcast %c3_i32 : i32 to vector<1x128xi32>
    %28 = arith.cmpi eq, %1, %27 : vector<1x128xi32>
    %29 = vector.extract_strided_slice %0 {offsets = [0, 3], sizes = [24, 1], strides = [1, 1]} : vector<24x24xf32> to vector<24x1xf32>
    %30 = vector.shape_cast %28 : vector<1x128xi1> to vector<1x128xi1>
    %31 = vector.broadcast %30 : vector<1x128xi1> to vector<24x128xi1>
    %32 = vector.shape_cast %29 : vector<24x1xf32> to vector<24x1xf32>
    %33 = vector.broadcast %32 : vector<24x1xf32> to vector<24x128xf32>
    %34 = arith.select %31, %33, %26 : vector<24x128xi1>, vector<24x128xf32>
    %c4_i32 = arith.constant 4 : i32
    %35 = vector.broadcast %c4_i32 : i32 to vector<1x128xi32>
    %36 = arith.cmpi eq, %1, %35 : vector<1x128xi32>
    %37 = vector.extract_strided_slice %0 {offsets = [0, 4], sizes = [24, 1], strides = [1, 1]} : vector<24x24xf32> to vector<24x1xf32>
    %38 = vector.shape_cast %36 : vector<1x128xi1> to vector<1x128xi1>
    %39 = vector.broadcast %38 : vector<1x128xi1> to vector<24x128xi1>
    %40 = vector.shape_cast %37 : vector<24x1xf32> to vector<24x1xf32>
    %41 = vector.broadcast %40 : vector<24x1xf32> to vector<24x128xf32>
    %42 = arith.select %39, %41, %34 : vector<24x128xi1>, vector<24x128xf32>
    %c5_i32 = arith.constant 5 : i32
    %43 = vector.broadcast %c5_i32 : i32 to vector<1x128xi32>
    %44 = arith.cmpi eq, %1, %43 : vector<1x128xi32>
    %45 = vector.extract_strided_slice %0 {offsets = [0, 5], sizes = [24, 1], strides = [1, 1]} : vector<24x24xf32> to vector<24x1xf32>
    %46 = vector.shape_cast %44 : vector<1x128xi1> to vector<1x128xi1>
    %47 = vector.broadcast %46 : vector<1x128xi1> to vector<24x128xi1>
    %48 = vector.shape_cast %45 : vector<24x1xf32> to vector<24x1xf32>
    %49 = vector.broadcast %48 : vector<24x1xf32> to vector<24x128xf32>
    %50 = arith.select %47, %49, %42 : vector<24x128xi1>, vector<24x128xf32>
    %c6_i32 = arith.constant 6 : i32
    %51 = vector.broadcast %c6_i32 : i32 to vector<1x128xi32>
    %52 = arith.cmpi eq, %1, %51 : vector<1x128xi32>
    %53 = vector.extract_strided_slice %0 {offsets = [0, 6], sizes = [24, 1], strides = [1, 1]} : vector<24x24xf32> to vector<24x1xf32>
    %54 = vector.shape_cast %52 : vector<1x128xi1> to vector<1x128xi1>
    %55 = vector.broadcast %54 : vector<1x128xi1> to vector<24x128xi1>
    %56 = vector.shape_cast %53 : vector<24x1xf32> to vector<24x1xf32>
    %57 = vector.broadcast %56 : vector<24x1xf32> to vector<24x128xf32>
    %58 = arith.select %55, %57, %50 : vector<24x128xi1>, vector<24x128xf32>
    %c7_i32 = arith.constant 7 : i32
    %59 = vector.broadcast %c7_i32 : i32 to vector<1x128xi32>
    %60 = arith.cmpi eq, %1, %59 : vector<1x128xi32>
    %61 = vector.extract_strided_slice %0 {offsets = [0, 7], sizes = [24, 1], strides = [1, 1]} : vector<24x24xf32> to vector<24x1xf32>
    %62 = vector.shape_cast %60 : vector<1x128xi1> to vector<1x128xi1>
    %63 = vector.broadcast %62 : vector<1x128xi1> to vector<24x128xi1>
    %64 = vector.shape_cast %61 : vector<24x1xf32> to vector<24x1xf32>
    %65 = vector.broadcast %64 : vector<24x1xf32> to vector<24x128xf32>
    %66 = arith.select %63, %65, %58 : vector<24x128xi1>, vector<24x128xf32>
    %c8_i32 = arith.constant 8 : i32
    %67 = vector.broadcast %c8_i32 : i32 to vector<1x128xi32>
    %68 = arith.cmpi eq, %1, %67 : vector<1x128xi32>
    %69 = vector.extract_strided_slice %0 {offsets = [0, 8], sizes = [24, 1], strides = [1, 1]} : vector<24x24xf32> to vector<24x1xf32>
    %70 = vector.shape_cast %68 : vector<1x128xi1> to vector<1x128xi1>
    %71 = vector.broadcast %70 : vector<1x128xi1> to vector<24x128xi1>
    %72 = vector.shape_cast %69 : vector<24x1xf32> to vector<24x1xf32>
    %73 = vector.broadcast %72 : vector<24x1xf32> to vector<24x128xf32>
    %74 = arith.select %71, %73, %66 : vector<24x128xi1>, vector<24x128xf32>
    %c9_i32 = arith.constant 9 : i32
    %75 = vector.broadcast %c9_i32 : i32 to vector<1x128xi32>
    %76 = arith.cmpi eq, %1, %75 : vector<1x128xi32>
    %77 = vector.extract_strided_slice %0 {offsets = [0, 9], sizes = [24, 1], strides = [1, 1]} : vector<24x24xf32> to vector<24x1xf32>
    %78 = vector.shape_cast %76 : vector<1x128xi1> to vector<1x128xi1>
    %79 = vector.broadcast %78 : vector<1x128xi1> to vector<24x128xi1>
    %80 = vector.shape_cast %77 : vector<24x1xf32> to vector<24x1xf32>
    %81 = vector.broadcast %80 : vector<24x1xf32> to vector<24x128xf32>
    %82 = arith.select %79, %81, %74 : vector<24x128xi1>, vector<24x128xf32>
    %c10_i32 = arith.constant 10 : i32
    %83 = vector.broadcast %c10_i32 : i32 to vector<1x128xi32>
    %84 = arith.cmpi eq, %1, %83 : vector<1x128xi32>
    %85 = vector.extract_strided_slice %0 {offsets = [0, 10], sizes = [24, 1], strides = [1, 1]} : vector<24x24xf32> to vector<24x1xf32>
    %86 = vector.shape_cast %84 : vector<1x128xi1> to vector<1x128xi1>
    %87 = vector.broadcast %86 : vector<1x128xi1> to vector<24x128xi1>
    %88 = vector.shape_cast %85 : vector<24x1xf32> to vector<24x1xf32>
    %89 = vector.broadcast %88 : vector<24x1xf32> to vector<24x128xf32>
    %90 = arith.select %87, %89, %82 : vector<24x128xi1>, vector<24x128xf32>
    %c11_i32 = arith.constant 11 : i32
    %91 = vector.broadcast %c11_i32 : i32 to vector<1x128xi32>
    %92 = arith.cmpi eq, %1, %91 : vector<1x128xi32>
    %93 = vector.extract_strided_slice %0 {offsets = [0, 11], sizes = [24, 1], strides = [1, 1]} : vector<24x24xf32> to vector<24x1xf32>
    %94 = vector.shape_cast %92 : vector<1x128xi1> to vector<1x128xi1>
    %95 = vector.broadcast %94 : vector<1x128xi1> to vector<24x128xi1>
    %96 = vector.shape_cast %93 : vector<24x1xf32> to vector<24x1xf32>
    %97 = vector.broadcast %96 : vector<24x1xf32> to vector<24x128xf32>
    %98 = arith.select %95, %97, %90 : vector<24x128xi1>, vector<24x128xf32>
    %c12_i32 = arith.constant 12 : i32
    %99 = vector.broadcast %c12_i32 : i32 to vector<1x128xi32>
    %100 = arith.cmpi eq, %1, %99 : vector<1x128xi32>
    %101 = vector.extract_strided_slice %0 {offsets = [0, 12], sizes = [24, 1], strides = [1, 1]} : vector<24x24xf32> to vector<24x1xf32>
    %102 = vector.shape_cast %100 : vector<1x128xi1> to vector<1x128xi1>
    %103 = vector.broadcast %102 : vector<1x128xi1> to vector<24x128xi1>
    %104 = vector.shape_cast %101 : vector<24x1xf32> to vector<24x1xf32>
    %105 = vector.broadcast %104 : vector<24x1xf32> to vector<24x128xf32>
    %106 = arith.select %103, %105, %98 : vector<24x128xi1>, vector<24x128xf32>
    %c13_i32 = arith.constant 13 : i32
    %107 = vector.broadcast %c13_i32 : i32 to vector<1x128xi32>
    %108 = arith.cmpi eq, %1, %107 : vector<1x128xi32>
    %109 = vector.extract_strided_slice %0 {offsets = [0, 13], sizes = [24, 1], strides = [1, 1]} : vector<24x24xf32> to vector<24x1xf32>
    %110 = vector.shape_cast %108 : vector<1x128xi1> to vector<1x128xi1>
    %111 = vector.broadcast %110 : vector<1x128xi1> to vector<24x128xi1>
    %112 = vector.shape_cast %109 : vector<24x1xf32> to vector<24x1xf32>
    %113 = vector.broadcast %112 : vector<24x1xf32> to vector<24x128xf32>
    %114 = arith.select %111, %113, %106 : vector<24x128xi1>, vector<24x128xf32>
    %c14_i32 = arith.constant 14 : i32
    %115 = vector.broadcast %c14_i32 : i32 to vector<1x128xi32>
    %116 = arith.cmpi eq, %1, %115 : vector<1x128xi32>
    %117 = vector.extract_strided_slice %0 {offsets = [0, 14], sizes = [24, 1], strides = [1, 1]} : vector<24x24xf32> to vector<24x1xf32>
    %118 = vector.shape_cast %116 : vector<1x128xi1> to vector<1x128xi1>
    %119 = vector.broadcast %118 : vector<1x128xi1> to vector<24x128xi1>
    %120 = vector.shape_cast %117 : vector<24x1xf32> to vector<24x1xf32>
    %121 = vector.broadcast %120 : vector<24x1xf32> to vector<24x128xf32>
    %122 = arith.select %119, %121, %114 : vector<24x128xi1>, vector<24x128xf32>
    %c15_i32 = arith.constant 15 : i32
    %123 = vector.broadcast %c15_i32 : i32 to vector<1x128xi32>
    %124 = arith.cmpi eq, %1, %123 : vector<1x128xi32>
    %125 = vector.extract_strided_slice %0 {offsets = [0, 15], sizes = [24, 1], strides = [1, 1]} : vector<24x24xf32> to vector<24x1xf32>
    %126 = vector.shape_cast %124 : vector<1x128xi1> to vector<1x128xi1>
    %127 = vector.broadcast %126 : vector<1x128xi1> to vector<24x128xi1>
    %128 = vector.shape_cast %125 : vector<24x1xf32> to vector<24x1xf32>
    %129 = vector.broadcast %128 : vector<24x1xf32> to vector<24x128xf32>
    %130 = arith.select %127, %129, %122 : vector<24x128xi1>, vector<24x128xf32>
    %c16_i32 = arith.constant 16 : i32
    %131 = vector.broadcast %c16_i32 : i32 to vector<1x128xi32>
    %132 = arith.cmpi eq, %1, %131 : vector<1x128xi32>
    %133 = vector.extract_strided_slice %0 {offsets = [0, 16], sizes = [24, 1], strides = [1, 1]} : vector<24x24xf32> to vector<24x1xf32>
    %134 = vector.shape_cast %132 : vector<1x128xi1> to vector<1x128xi1>
    %135 = vector.broadcast %134 : vector<1x128xi1> to vector<24x128xi1>
    %136 = vector.shape_cast %133 : vector<24x1xf32> to vector<24x1xf32>
    %137 = vector.broadcast %136 : vector<24x1xf32> to vector<24x128xf32>
    %138 = arith.select %135, %137, %130 : vector<24x128xi1>, vector<24x128xf32>
    %c17_i32 = arith.constant 17 : i32
    %139 = vector.broadcast %c17_i32 : i32 to vector<1x128xi32>
    %140 = arith.cmpi eq, %1, %139 : vector<1x128xi32>
    %141 = vector.extract_strided_slice %0 {offsets = [0, 17], sizes = [24, 1], strides = [1, 1]} : vector<24x24xf32> to vector<24x1xf32>
    %142 = vector.shape_cast %140 : vector<1x128xi1> to vector<1x128xi1>
    %143 = vector.broadcast %142 : vector<1x128xi1> to vector<24x128xi1>
    %144 = vector.shape_cast %141 : vector<24x1xf32> to vector<24x1xf32>
    %145 = vector.broadcast %144 : vector<24x1xf32> to vector<24x128xf32>
    %146 = arith.select %143, %145, %138 : vector<24x128xi1>, vector<24x128xf32>
    %c18_i32 = arith.constant 18 : i32
    %147 = vector.broadcast %c18_i32 : i32 to vector<1x128xi32>
    %148 = arith.cmpi eq, %1, %147 : vector<1x128xi32>
    %149 = vector.extract_strided_slice %0 {offsets = [0, 18], sizes = [24, 1], strides = [1, 1]} : vector<24x24xf32> to vector<24x1xf32>
    %150 = vector.shape_cast %148 : vector<1x128xi1> to vector<1x128xi1>
    %151 = vector.broadcast %150 : vector<1x128xi1> to vector<24x128xi1>
    %152 = vector.shape_cast %149 : vector<24x1xf32> to vector<24x1xf32>
    %153 = vector.broadcast %152 : vector<24x1xf32> to vector<24x128xf32>
    %154 = arith.select %151, %153, %146 : vector<24x128xi1>, vector<24x128xf32>
    %c19_i32 = arith.constant 19 : i32
    %155 = vector.broadcast %c19_i32 : i32 to vector<1x128xi32>
    %156 = arith.cmpi eq, %1, %155 : vector<1x128xi32>
    %157 = vector.extract_strided_slice %0 {offsets = [0, 19], sizes = [24, 1], strides = [1, 1]} : vector<24x24xf32> to vector<24x1xf32>
    %158 = vector.shape_cast %156 : vector<1x128xi1> to vector<1x128xi1>
    %159 = vector.broadcast %158 : vector<1x128xi1> to vector<24x128xi1>
    %160 = vector.shape_cast %157 : vector<24x1xf32> to vector<24x1xf32>
    %161 = vector.broadcast %160 : vector<24x1xf32> to vector<24x128xf32>
    %162 = arith.select %159, %161, %154 : vector<24x128xi1>, vector<24x128xf32>
    %c20_i32 = arith.constant 20 : i32
    %163 = vector.broadcast %c20_i32 : i32 to vector<1x128xi32>
    %164 = arith.cmpi eq, %1, %163 : vector<1x128xi32>
    %165 = vector.extract_strided_slice %0 {offsets = [0, 20], sizes = [24, 1], strides = [1, 1]} : vector<24x24xf32> to vector<24x1xf32>
    %166 = vector.shape_cast %164 : vector<1x128xi1> to vector<1x128xi1>
    %167 = vector.broadcast %166 : vector<1x128xi1> to vector<24x128xi1>
    %168 = vector.shape_cast %165 : vector<24x1xf32> to vector<24x1xf32>
    %169 = vector.broadcast %168 : vector<24x1xf32> to vector<24x128xf32>
    %170 = arith.select %167, %169, %162 : vector<24x128xi1>, vector<24x128xf32>
    %c21_i32 = arith.constant 21 : i32
    %171 = vector.broadcast %c21_i32 : i32 to vector<1x128xi32>
    %172 = arith.cmpi eq, %1, %171 : vector<1x128xi32>
    %173 = vector.extract_strided_slice %0 {offsets = [0, 21], sizes = [24, 1], strides = [1, 1]} : vector<24x24xf32> to vector<24x1xf32>
    %174 = vector.shape_cast %172 : vector<1x128xi1> to vector<1x128xi1>
    %175 = vector.broadcast %174 : vector<1x128xi1> to vector<24x128xi1>
    %176 = vector.shape_cast %173 : vector<24x1xf32> to vector<24x1xf32>
    %177 = vector.broadcast %176 : vector<24x1xf32> to vector<24x128xf32>
    %178 = arith.select %175, %177, %170 : vector<24x128xi1>, vector<24x128xf32>
    %c22_i32 = arith.constant 22 : i32
    %179 = vector.broadcast %c22_i32 : i32 to vector<1x128xi32>
    %180 = arith.cmpi eq, %1, %179 : vector<1x128xi32>
    %181 = vector.extract_strided_slice %0 {offsets = [0, 22], sizes = [24, 1], strides = [1, 1]} : vector<24x24xf32> to vector<24x1xf32>
    %182 = vector.shape_cast %180 : vector<1x128xi1> to vector<1x128xi1>
    %183 = vector.broadcast %182 : vector<1x128xi1> to vector<24x128xi1>
    %184 = vector.shape_cast %181 : vector<24x1xf32> to vector<24x1xf32>
    %185 = vector.broadcast %184 : vector<24x1xf32> to vector<24x128xf32>
    %186 = arith.select %183, %185, %178 : vector<24x128xi1>, vector<24x128xf32>
    %c23_i32 = arith.constant 23 : i32
    %187 = vector.broadcast %c23_i32 : i32 to vector<1x128xi32>
    %188 = arith.cmpi eq, %1, %187 : vector<1x128xi32>
    %189 = vector.extract_strided_slice %0 {offsets = [0, 23], sizes = [24, 1], strides = [1, 1]} : vector<24x24xf32> to vector<24x1xf32>
    %190 = vector.shape_cast %188 : vector<1x128xi1> to vector<1x128xi1>
    %191 = vector.broadcast %190 : vector<1x128xi1> to vector<24x128xi1>
    %192 = vector.shape_cast %189 : vector<24x1xf32> to vector<24x1xf32>
    %193 = vector.broadcast %192 : vector<24x1xf32> to vector<24x128xf32>
    %194 = arith.select %191, %193, %186 : vector<24x128xi1>, vector<24x128xf32>
    %c0_3 = arith.constant 0 : index
    %c0_4 = arith.constant 0 : index
    %195 = vector.load %arg3[%c0_3, %c0_4] : memref<24x128xf32, #tpu.memory_space<vmem>>, vector<24x128xf32>
    tpu.vector_store %arg3[%c0_3, %c0_4], %194 {strides = array<i32>} : memref<24x128xf32, #tpu.memory_space<vmem>>, vector<24x128xf32>,
    return
  }
  func.func @transform_0(%arg0: i32) -> (i32, i32) {
    %c0_i32 = arith.constant 0 : i32
    %c0_i32_0 = arith.constant 0 : i32
    return %c0_i32, %arg0 : i32, i32
  }
  func.func @transform_1(%arg0: i32) -> (i32, i32) {
    %c0_i32 = arith.constant 0 : i32
    %c0_i32_0 = arith.constant 0 : i32
    %c0_i32_1 = arith.constant 0 : i32
    return %c0_i32, %c0_i32_0 : i32, i32
  }
  func.func @transform_2(%arg0: i32) -> (i32, i32) {
    %c0_i32 = arith.constant 0 : i32
    %c0_i32_0 = arith.constant 0 : i32
    return %c0_i32, %arg0 : i32, i32
  }
}

</mosaic_0001>

<bundles_post_ra>
// kernel: tpu_custom_call.1
= control target key start
LH: loop header
LB: loop body
LE: loop exit
PB: predicated region body
PF: predicated region fallthrough
CT: control target
= control target key end

     0   :  { %7 = vsyncpa [#allocation3], 0  ;;  %s1196_s0 = inlined_call_operand.hbm [shape: s32[1,128], index: 0, kind: input, shape index: {}]   ;;  %s1197_s1 = inlined_call_operand.hbm [shape: f32[24,24], index: 1, kind: input, shape index: {}]   ;;  %s1198_s2 = inlined_call_operand.hbm [shape: f32[24,128], index: 2, kind: output, shape index: {}]  }
   0x1   :  { %8 = vsyncpa [#allocation6], 0 }
   0x2   :  { %9 = vsyncpa [#allocation4], 0  ;;  %s15_s11 = sshll.u32 %s1196_s0, 4  ;;  %s697_s12 = smov [#allocation2]   ;;  %s16_s11 = int_to_ptr.hbm [resolvable:$true] %s15_s11 }
   0x3   :  { %s17_s13 = sshll.u32 %s697_s12, 4  ;;  %s25_s16 = sshll.u32 %s1197_s1, 4  ;;  %s18_s13 = int_to_ptr.vmem [resolvable:$true] %s17_s13  ;;  %s26_s16 = int_to_ptr.hbm [resolvable:$true] %s25_s16 }
   0x4   :  { %20 = dma.hbm_to_vmem [thread:$0]  %s16_s11, 16, %s18_s13, [#allocation3]  }
   0x5   :  { %s698_s17 = smov [#allocation5]   ;;  %s699_s19 = smov 128  }
   0x6   :  { %s27_s18 = sshll.u32 %s698_s17, 4  ;;  %s700_s20 = smov 8   ;;  %s28_s18 = int_to_ptr.vmem [resolvable:$true] %s27_s18 }
   0x7   :  { %33 = dma.hbm_to_vmem [thread:$0]  %s26_s16, 384, %s28_s18, [#allocation6], %s699_s19, %s699_s19, %s700_s20  }
   0x8   :  { %691 = dma.done.wait [#allocation3], 16  }
   0x9   :  { %692 = vsyncadd [#allocation3], 4294967280 }
   0xa   :  { %693 = dma.done.wait [#allocation6], 384  }
   0xb   :  { %694 = vsyncadd [#allocation6], 4294966912  ;;  %v701_v0 = vmov 0   ;;  %v702_v1 = vmov 1   ;;  %v752_v2 = vld [vmem:[#allocation5] sm:$0xff]  ;;  %v754_v3 = vld [vmem:[#allocation5 + $0x8] sm:$0xff] }
   0xc   :  { %558 = vset.pattern.permute.xlu1 %v701_v0  ;;  %557 = vset.pattern.permute.xlu0 %v701_v0  ;;  %v756_v4 = vld [vmem:[#allocation5 + $0x10] sm:$0xff]  ;;  %v703_v5 = vmov 2   ;;  %v704_v6 = vmov 3   ;;  %v705_v7 = vmov 5   ;;  %v706_v8 = vmov 4   ;;  %s725_s0 = smov [#allocation7]  }
   0xd   :  { %560 = vset.pattern.permute.xlu2 %v702_v1  ;;  %62 = vperm.xlu1 %558, %v756_v4   ;;  %v707_v9 = vmov 7   ;;  %v708_v10 = vmov 8   ;;  %v709_v11 = vmov 6   ;;  %v710_v12 = vmov 10   ;;  %v795_v18 = vld [vmem:[#allocation2] sm:$0x1] }
   0xe   :  { %52 = vperm.xlu0 %557, %v752_v2   ;;  %77 = vperm.xlu2 %560, %v754_v3   ;;  %v711_v13 = vmov 12   ;;  %v712_v14 = vmov 13   ;;  %v713_v15 = vmov 9   ;;  %v714_v17 = vmov 15   ;;  %s512_s1 = sshll.u32 %s725_s0, 4  ;;  %s514_s23 = sshll.u32 %s1198_s2, 4  ;;  %s513_s1 = int_to_ptr.vmem [resolvable:$true] %s512_s1  ;;  %s515_s23 = int_to_ptr.hbm [resolvable:$true] %s514_s23 }
   0xf   :  { %vm46_vm0 = vcmp.eq.s32.totalorder %v795_v18, 0  ;;  %vm68_vm1 = vcmp.eq.s32.totalorder %v795_v18, 1  ;;  %vm87_vm2 = vcmp.eq.s32.totalorder %v795_v18, 2  ;;  %v715_v22 = vmov 11  }
  0x10   :  { %v47_v20 = vsel %vm46_vm0, 1, %v701_v0  ;;  %v69_v21 = vsel %vm68_vm1, 1, %v701_v0  ;;  %v88_v23 = vsel %vm87_vm2, 1, %v701_v0  ;;  %v716_v28 = vmov 17  }
  0x11   :  { %v48_v24 = vperm.slane %v47_v20, 0  ;;  %v70_v25 = vperm.slane %v69_v21, 0  ;;  %v89_v26 = vperm.slane %v88_v23, 0  ;;  %vm106_vm6 = vcmp.eq.s32.totalorder %v795_v18, 3 }
  0x12   :  { %vm125_vm7 = vcmp.eq.s32.totalorder %v795_v18, 4  ;;  %v107_v44 = vsel %vm106_vm6, 1, %v701_v0  ;;  %v717_v49 = vmov 18   ;;  %vm144_vm10 = vcmp.eq.s32.totalorder %v795_v18, 5 }
  0x13   :  { %vm807_vm3 = vcmp.eq.s32.totalorder %v48_v24, 1  ;;  %vm812_vm4 = vcmp.eq.s32.totalorder %v70_v25, 1  ;;  %vm816_vm5 = vcmp.eq.s32.totalorder %v89_v26, 1  ;;  %v126_v45 = vsel %vm125_vm7, 1, %v701_v0 }
  0x14   :  { %v108_v46 = vperm.slane %v107_v44, 0  ;;  %v127_v47 = vperm.slane %v126_v45, 0  ;;  %v145_v60 = vsel %vm144_vm10, 1, %v701_v0  ;;  %vm163_vm11 = vcmp.eq.s32.totalorder %v795_v18, 6 }
  0x15   :  { %559 = vset.pattern.permute.xlu1 %v702_v1  ;;  %v718_v62 = vmov 14   ;;  %vm182_vm12 = vcmp.eq.s32.totalorder %v795_v18, 7  ;;  %v720_v29 = vmov 16   ;;  %vm220_vm0 = vcmp.eq.s32.totalorder %v795_v18, 9 }
  0x16   :  { %57 = vperm.xlu0 %557, %v754_v3   ;;  %73 = vperm.xlu1 %559, %v752_v2   ;;  %vm846_vm8 = vcmp.eq.s32.totalorder %v108_v46, 1  ;;  %vm853_vm9 = vcmp.eq.s32.totalorder %v127_v47, 1  ;;  %vm201_vm1 = vcmp.eq.s32.totalorder %v795_v18, 8  ;;  %vm239_vm2 = vcmp.eq.s32.totalorder %v795_v18, 10 }
  0x17   :  { %81 = vperm.xlu2 %560, %v756_v4   ;;  %v722_v44 = vmov 23   ;;  %vm258_vm6 = vcmp.eq.s32.totalorder %v795_v18, 11  ;;  %vm277_vm7 = vcmp.eq.s32.totalorder %v795_v18, 12  ;;  %vm315_vm10 = vcmp.eq.s32.totalorder %v795_v18, 14 }
  0x1e   :  { %561 = vset.pattern.permute.xlu0 %v703_v5  ;;  %562 = vset.pattern.permute.xlu1 %v703_v5 }
  0x1f   :  { %92 = vperm.xlu0 %561, %v752_v2   ;;  %96 = vperm.xlu1 %562, %v754_v3  }
  0x20   :  { %563 = vset.pattern.permute.xlu2 %v703_v5  ;;  %v146_v5 = vperm.slane %v145_v60, 0  ;;  %v278_v60 = vsel %vm277_vm7, 1, %v701_v0  ;;  %vm486_vm7 = vcmp.eq.s32.totalorder %v795_v18, 23 }
  0x21   :  { %100 = vperm.xlu2 %563, %v756_v4  }
  0x22   :  { %vm878_vm13 = vcmp.eq.s32.totalorder %v146_v5, 1 }
  0x27   :  { %566 = vset.pattern.permute.xlu0 %v704_v6  ;;  %564 = vset.pattern.permute.xlu1 %v704_v6 }
  0x28   :  { %119 = vperm.xlu0 %566, %v756_v4   ;;  %111 = vperm.xlu1 %564, %v752_v2  }
  0x29   :  { %565 = vset.pattern.permute.xlu2 %v704_v6  ;;  %v164_v6 = vsel %vm163_vm11, 1, %v701_v0  ;;  %vm296_vm11 = vcmp.eq.s32.totalorder %v795_v18, 13 }
  0x2a   :  { %115 = vperm.xlu2 %565, %v754_v3  }
  0x30   :  { %570 = vset.pattern.permute.xlu0 %v705_v7  ;;  %567 = vset.pattern.permute.xlu1 %v706_v8 }
  0x31   :  { %153 = vperm.xlu0 %570, %v754_v3   ;;  %130 = vperm.xlu1 %567, %v752_v2  }
  0x32   :  { %568 = vset.pattern.permute.xlu2 %v706_v8  ;;  %v165_v8 = vperm.slane %v164_v6, 0 }
  0x33   :  { %134 = vperm.xlu2 %568, %v754_v3  }
  0x34   :  { %vm887_vm14 = vcmp.eq.s32.totalorder %v165_v8, 1 }
  0x39   :  { %574 = vset.pattern.permute.xlu0 %v707_v9  ;;  %138 = vperm.xlu1 %567, %v756_v4  }
  0x3a   :  { %187 = vperm.xlu0 %574, %v752_v2  }
  0x3b   :  { %569 = vset.pattern.permute.xlu2 %v705_v7 }
  0x3c   :  { %149 = vperm.xlu2 %569, %v752_v2  }
  0x41   :  { %571 = vset.pattern.permute.xlu1 %v705_v7 }
  0x42   :  { %579 = vset.pattern.permute.xlu0 %v708_v10  ;;  %157 = vperm.xlu1 %571, %v756_v4  }
  0x43   :  { %214 = vperm.xlu0 %579, %v756_v4  }
  0x44   :  { %572 = vset.pattern.permute.xlu2 %v709_v11 }
  0x45   :  { %168 = vperm.xlu2 %572, %v752_v2  }
  0x4a   :  { %573 = vset.pattern.permute.xlu1 %v709_v11 }
  0x4b   :  { %583 = vset.pattern.permute.xlu0 %v710_v12  ;;  %172 = vperm.xlu1 %573, %v754_v3  }
  0x4c   :  { %248 = vperm.xlu0 %583, %v754_v3  }
  0x4d   :  { %176 = vperm.xlu2 %572, %v756_v4  }
  0x53   :  { %575 = vset.pattern.permute.xlu1 %v707_v9 }
  0x54   :  { %587 = vset.pattern.permute.xlu0 %v711_v13  ;;  %191 = vperm.xlu1 %575, %v754_v3  }
  0x55   :  { %576 = vset.pattern.permute.xlu2 %v707_v9  ;;  %282 = vperm.xlu0 %587, %v752_v2   ;;  %v719_v9 = vmov 20  }
  0x56   :  { %195 = vperm.xlu2 %576, %v756_v4  }
  0x5c   :  { %577 = vset.pattern.permute.xlu1 %v708_v10 }
  0x5d   :  { %206 = vperm.xlu1 %577, %v752_v2   ;;  %592 = vset.pattern.permute.xlu0 %v712_v14 }
  0x5e   :  { %578 = vset.pattern.permute.xlu2 %v708_v10  ;;  %309 = vperm.xlu0 %592, %v756_v4  }
  0x5f   :  { %210 = vperm.xlu2 %578, %v754_v3  }
  0x65   :  { %580 = vset.pattern.permute.xlu1 %v713_v15 }
  0x66   :  { %225 = vperm.xlu1 %580, %v752_v2   ;;  %596 = vset.pattern.permute.xlu0 %v714_v17 }
  0x67   :  { %581 = vset.pattern.permute.xlu2 %v713_v15  ;;  %343 = vperm.xlu0 %596, %v754_v3  }
  0x68   :  { %229 = vperm.xlu2 %581, %v754_v3   ;;  %v78_v16 = vpop.permute.xlu2 %77 }
  0x6e   :  { %233 = vperm.xlu1 %580, %v756_v4  }
  0x6f   :  { %600 = vset.pattern.permute.xlu0 %v716_v28 }
  0x70   :  { %582 = vset.pattern.permute.xlu2 %v710_v12  ;;  %377 = vperm.xlu0 %600, %v752_v2  }
  0x71   :  { %244 = vperm.xlu2 %582, %v752_v2   ;;  %v82_v19 = vpop.permute.xlu2 %81 }
  0x76   :  { %584 = vset.pattern.permute.xlu1 %v710_v12  ;;  %v183_v12 = vsel %vm182_vm12, 1, %v701_v0 }
  0x77   :  { %252 = vperm.xlu1 %584, %v756_v4   ;;  %v184_v20 = vperm.slane %v183_v12, 0 }
  0x78   :  { %605 = vset.pattern.permute.xlu0 %v717_v49 }
  0x79   :  { %585 = vset.pattern.permute.xlu2 %v715_v22  ;;  %404 = vperm.xlu0 %605, %v756_v4   ;;  %vm899_vm15 = vcmp.eq.s32.totalorder %v184_v20, 1 }
  0x7a   :  { %263 = vperm.xlu2 %585, %v752_v2  }
  0x7b   :  { %v101_v27 = vpop.permute.xlu2 %100 }
  0x7f   :  { %v63_v31 = vpop.permute.xlu1 %62  ;;  %586 = vset.pattern.permute.xlu1 %v715_v22 }
  0x80   :  { %v53_v32 = vpop.permute.xlu0 %52  ;;  %v67_v34 = vsel %vm807_vm3, %v63_v31, 0.0  ;;  %267 = vperm.xlu1 %586, %v754_v3   ;;  %v721_v31 = vmov 22  }
  0x81   :  { %v86_v35 = vsel %vm812_vm4, %v82_v19, %v67_v34  ;;  %v65_v38 = vsel %vm807_vm3, %v53_v32, 0.0  ;;  %609 = vset.pattern.permute.xlu0 %v719_v9 }
  0x82   :  { %271 = vperm.xlu2 %585, %v756_v4   ;;  %v105_v36 = vsel %vm816_vm5, %v101_v27, %v86_v35  ;;  %438 = vperm.xlu0 %609, %v754_v3  }
  0x84   :  { %v116_v37 = vpop.permute.xlu2 %115 }
  0x88   :  { %v58_v39 = vpop.permute.xlu0 %57  ;;  %588 = vset.pattern.permute.xlu1 %v711_v13  ;;  %v74_v41 = vpop.permute.xlu1 %73 }
  0x89   :  { %v66_v40 = vsel %vm807_vm3, %v58_v39, 0.0  ;;  %v84_v43 = vsel %vm812_vm4, %v74_v41, %v65_v38  ;;  %286 = vperm.xlu1 %588, %v754_v3   ;;  %v221_v39 = vsel %vm220_vm0, 1, %v701_v0  ;;  %v240_v41 = vsel %vm239_vm2, 1, %v701_v0 }
  0x8a   :  { %v85_v42 = vsel %vm812_vm4, %v78_v16, %v66_v40  ;;  %589 = vset.pattern.permute.xlu2 %v711_v13  ;;  %613 = vset.pattern.permute.xlu0 %v721_v31  ;;  %v202_v40 = vsel %vm201_vm1, 1, %v701_v0  ;;  %v241_v46 = vperm.slane %v240_v41, 0  ;;  %vm372_vm2 = vcmp.eq.s32.totalorder %v795_v18, 17 }
  0x8b   :  { %290 = vperm.xlu2 %589, %v756_v4   ;;  %472 = vperm.xlu0 %613, %v752_v2   ;;  %v203_v45 = vperm.slane %v202_v40, 0 }
  0x8d   :  { %v135_v48 = vpop.permute.xlu2 %134  ;;  %vm943_vm4 = vcmp.eq.s32.totalorder %v203_v45, 1 }
  0x91   :  { %v93_v50 = vpop.permute.xlu0 %92  ;;  %590 = vset.pattern.permute.xlu1 %v712_v14  ;;  %v97_v53 = vpop.permute.xlu1 %96 }
  0x92   :  { %v103_v52 = vsel %vm816_vm5, %v93_v50, %v84_v43  ;;  %v104_v55 = vsel %vm816_vm5, %v97_v53, %v85_v42  ;;  %301 = vperm.xlu1 %590, %v752_v2   ;;  %v222_v42 = vperm.slane %v221_v39, 0  ;;  %vm950_vm5 = vcmp.eq.s32.totalorder %v241_v46, 1 }
  0x93   :  { %591 = vset.pattern.permute.xlu2 %v712_v14  ;;  %v123_v56 = vsel %vm846_vm8, %v116_v37, %v104_v55  ;;  %618 = vset.pattern.permute.xlu0 %v722_v44 }
  0x94   :  { %305 = vperm.xlu2 %591, %v754_v3   ;;  %v142_v57 = vsel %vm853_vm9, %v135_v48, %v123_v56  ;;  %499 = vperm.xlu0 %618, %v756_v4   ;;  %vm939_vm3 = vcmp.eq.s32.totalorder %v222_v42, 1 }
  0x96   :  { %v150_v58 = vpop.permute.xlu2 %149 }
  0x9a   :  { %v120_v59 = vpop.permute.xlu0 %119  ;;  %593 = vset.pattern.permute.xlu1 %v718_v62  ;;  %v112_v63 = vpop.permute.xlu1 %111 }
  0x9b   :  { %v124_v61 = vsel %vm846_vm8, %v120_v59, %v105_v36  ;;  %v122_v1 = vsel %vm846_vm8, %v112_v63, %v103_v52  ;;  %320 = vperm.xlu1 %593, %v752_v2   ;;  %v259_v59 = vsel %vm258_vm6, 1, %v701_v0  ;;  %v279_v63 = vperm.slane %v278_v60, 0 }
  0x9c   :  { %594 = vset.pattern.permute.xlu2 %v718_v62  ;;  %v260_v62 = vperm.slane %v259_v59, 0  ;;  %vm448_vm6 = vcmp.eq.s32.totalorder %v795_v18, 21 }
  0x9d   :  { %324 = vperm.xlu2 %594, %v754_v3  }
  0x9e   :  { %vm972_vm8 = vcmp.eq.s32.totalorder %v260_v62, 1 }
  0x9f   :  { %v169_v7 = vpop.permute.xlu2 %168 }
  0xa3   :  { %v154_v11 = vpop.permute.xlu0 %153  ;;  %328 = vperm.xlu1 %593, %v756_v4   ;;  %v131_v14 = vpop.permute.xlu1 %130 }
  0xa4   :  { %v161_v13 = vsel %vm878_vm13, %v154_v11, %v142_v57  ;;  %v141_v16 = vsel %vm853_vm9, %v131_v14, %v122_v1  ;;  %v723_v57 = vmov 19  }
  0xa5   :  { %595 = vset.pattern.permute.xlu2 %v714_v17  ;;  %v160_v19 = vsel %vm878_vm13, %v150_v58, %v141_v16 }
  0xa6   :  { %339 = vperm.xlu2 %595, %v752_v2   ;;  %v179_v21 = vsel %vm887_vm14, %v169_v7, %v160_v19  ;;  %v724_v19 = vmov 21  }
  0xa7   :  { %v177_v22 = vpop.permute.xlu2 %176 }
  0xab   :  { %597 = vset.pattern.permute.xlu1 %v714_v17  ;;  %v139_v24 = vpop.permute.xlu1 %138 }
  0xac   :  { %v188_v25 = vpop.permute.xlu0 %187  ;;  %v143_v26 = vsel %vm853_vm9, %v139_v24, %v124_v61  ;;  %347 = vperm.xlu1 %597, %v756_v4   ;;  %vm978_vm9 = vcmp.eq.s32.totalorder %v279_v63, 1 }
  0xad   :  { %v908_v27 = vsel %vm899_vm15, %v188_v25, %v179_v21 }
  0xae   :  { %598 = vset.pattern.permute.xlu2 %v720_v29 }
  0xaf   :  { %358 = vperm.xlu2 %598, %v752_v2  }
  0xb0   :  { %v196_v30 = vpop.permute.xlu2 %195 }
  0xb4   :  { %599 = vset.pattern.permute.xlu1 %v720_v29  ;;  %v158_v17 = vpop.permute.xlu1 %157  ;;  %v297_v29 = vsel %vm296_vm11, 1, %v701_v0 }
  0xb5   :  { %v162_v32 = vsel %vm878_vm13, %v158_v17, %v143_v26  ;;  %362 = vperm.xlu1 %599, %v754_v3   ;;  %v215_v38 = vpop.permute.xlu0 %214 }
  0xb6   :  { %v181_v33 = vsel %vm887_vm14, %v177_v22, %v162_v32  ;;  %v298_v32 = vperm.slane %v297_v29, 0 }
  0xb7   :  { %366 = vperm.xlu2 %598, %v756_v4   ;;  %v922_v34 = vsel %vm899_vm15, %v196_v30, %v181_v33 }
  0xb8   :  { %v219_v14 = vsel %vm943_vm4, %v215_v38, %v922_v34  ;;  %vm1029_vm13 = vcmp.eq.s32.totalorder %v298_v32, 1 }
  0xb9   :  { %v211_v35 = vpop.permute.xlu2 %210 }
  0xbd   :  { %601 = vset.pattern.permute.xlu1 %v716_v28  ;;  %v173_v36 = vpop.permute.xlu1 %172 }
  0xbe   :  { %v180_v37 = vsel %vm887_vm14, %v173_v36, %v161_v13  ;;  %381 = vperm.xlu1 %601, %v754_v3   ;;  %v249_v52 = vpop.permute.xlu0 %248  ;;  %vm353_vm14 = vcmp.eq.s32.totalorder %v795_v18, 16 }
  0xbf   :  { %602 = vset.pattern.permute.xlu2 %v716_v28  ;;  %v354_v39 = vsel %vm353_vm14, 1, %v701_v0 }
  0xc0   :  { %385 = vperm.xlu2 %602, %v756_v4  }
  0xc2   :  { %v230_v43 = vpop.permute.xlu2 %229 }
  0xc6   :  { %603 = vset.pattern.permute.xlu1 %v717_v49  ;;  %v192_v28 = vpop.permute.xlu1 %191 }
  0xc7   :  { %v199_v50 = vsel %vm899_vm15, %v192_v28, %v180_v37  ;;  %396 = vperm.xlu1 %603, %v752_v2   ;;  %v283_v8 = vpop.permute.xlu0 %282  ;;  %vm334_vm15 = vcmp.eq.s32.totalorder %v795_v18, 15 }
  0xc8   :  { %604 = vset.pattern.permute.xlu2 %v717_v49  ;;  %v218_v53 = vsel %vm943_vm4, %v211_v35, %v199_v50  ;;  %v335_v40 = vsel %vm334_vm15, 1, %v701_v0 }
  0xc9   :  { %400 = vperm.xlu2 %604, %v754_v3   ;;  %v237_v54 = vsel %vm939_vm3, %v230_v43, %v218_v53  ;;  %v336_v42 = vperm.slane %v335_v40, 0 }
  0xca   :  { %v256_v55 = vsel %vm950_vm5, %v249_v52, %v237_v54 }
  0xcb   :  { %v245_v56 = vpop.permute.xlu2 %244  ;;  %vm1058_vm1 = vcmp.eq.s32.totalorder %v336_v42, 1 }
  0xcf   :  { %606 = vset.pattern.permute.xlu1 %v723_v57  ;;  %v207_v58 = vpop.permute.xlu1 %206 }
  0xd0   :  { %v217_v49 = vsel %vm943_vm4, %v207_v58, %v908_v27  ;;  %415 = vperm.xlu1 %606, %v752_v2   ;;  %v316_v27 = vsel %vm315_vm10, 1, %v701_v0  ;;  %v310_v54 = vpop.permute.xlu0 %309  ;;  %vm410_vm4 = vcmp.eq.s32.totalorder %v795_v18, 19 }
  0xd1   :  { %607 = vset.pattern.permute.xlu2 %v723_v57  ;;  %v317_v30 = vperm.slane %v316_v27, 0 }
  0xd2   :  { %419 = vperm.xlu2 %607, %v754_v3  }
  0xd3   :  { %vm1025_vm12 = vcmp.eq.s32.totalorder %v317_v30, 1 }
  0xd4   :  { %v264_v61 = vpop.permute.xlu2 %263 }
  0xd8   :  { %423 = vperm.xlu1 %606, %v756_v4   ;;  %v226_v1 = vpop.permute.xlu1 %225 }
  0xd9   :  { %v236_v6 = vsel %vm939_vm3, %v226_v1, %v217_v49 }
  0xda   :  { %608 = vset.pattern.permute.xlu2 %v719_v9  ;;  %v255_v10 = vsel %vm950_vm5, %v245_v56, %v236_v6  ;;  %v344_v56 = vpop.permute.xlu0 %343  ;;  %v373_v6 = vsel %vm372_vm2, 1, %v701_v0 }
  0xdb   :  { %434 = vperm.xlu2 %608, %v752_v2   ;;  %v274_v11 = vsel %vm972_vm8, %v264_v61, %v255_v10 }
  0xdc   :  { %v272_v12 = vpop.permute.xlu2 %271  ;;  %v293_v13 = vsel %vm978_vm9, %v283_v8, %v274_v11 }
  0xe0   :  { %610 = vset.pattern.permute.xlu1 %v719_v9  ;;  %v234_v15 = vpop.permute.xlu1 %233 }
  0xe1   :  { %v238_v16 = vsel %vm939_vm3, %v234_v15, %v219_v14  ;;  %442 = vperm.xlu1 %610, %v756_v4   ;;  %vm391_vm3 = vcmp.eq.s32.totalorder %v795_v18, 18  ;;  %v411_v15 = vsel %vm410_vm4, 1, %v701_v0 }
  0xe2   :  { %v378_v49 = vpop.permute.xlu0 %377  ;;  %v392_v8 = vsel %vm391_vm3, 1, %v701_v0 }
  0xe3   :  { %611 = vset.pattern.permute.xlu2 %v724_v19  ;;  %v393_v14 = vperm.slane %v392_v8, 0 }
  0xe4   :  { %453 = vperm.xlu2 %611, %v752_v2  }
  0xe5   :  { %v998_v20 = vpop.permute.xlu2 %290  ;;  %vm1108_vm10 = vcmp.eq.s32.totalorder %v393_v14, 1 }
  0xe9   :  { %612 = vset.pattern.permute.xlu1 %v724_v19  ;;  %v253_v21 = vpop.permute.xlu1 %252 }
  0xea   :  { %v257_v22 = vsel %vm950_vm5, %v253_v21, %v238_v16  ;;  %457 = vperm.xlu1 %612, %v754_v3   ;;  %vm429_vm5 = vcmp.eq.s32.totalorder %v795_v18, 20  ;;  %v449_v21 = vsel %vm448_vm6, 1, %v701_v0 }
  0xeb   :  { %v1005_v9 = vsel %vm972_vm8, %v272_v12, %v257_v22  ;;  %v405_v61 = vpop.permute.xlu0 %404  ;;  %v374_v12 = vperm.slane %v373_v6, 0  ;;  %v430_v19 = vsel %vm429_vm5, 1, %v701_v0  ;;  %v487_v22 = vsel %vm486_vm7, 1, %v701_v0 }
  0xec   :  { %461 = vperm.xlu2 %611, %v756_v4   ;;  %v295_v23 = vsel %vm978_vm9, %v998_v20, %v1005_v9  ;;  %v450_v27 = vperm.slane %v449_v21, 0  ;;  %v488_v29 = vperm.slane %v487_v22, 0 }
  0xed   :  { %v314_v5 = vsel %vm1029_vm13, %v310_v54, %v295_v23  ;;  %v412_v23 = vperm.slane %v411_v15, 0 }
  0xee   :  { %v306_v24 = vpop.permute.xlu2 %305  ;;  %vm1124_vm14 = vcmp.eq.s32.totalorder %v450_v27, 1  ;;  %vm1130_vm15 = vcmp.eq.s32.totalorder %v488_v29, 1 }
  0xef   :  { %vm1114_vm11 = vcmp.eq.s32.totalorder %v412_v23, 1 }
  0xf2   :  { %614 = vset.pattern.permute.xlu1 %v721_v31  ;;  %v268_v25 = vpop.permute.xlu1 %267 }
  0xf3   :  { %v275_v26 = vsel %vm972_vm8, %v268_v25, %v256_v55  ;;  %476 = vperm.xlu1 %614, %v754_v3   ;;  %vm467_vm8 = vcmp.eq.s32.totalorder %v795_v18, 22 }
  0xf4   :  { %615 = vset.pattern.permute.xlu2 %v721_v31  ;;  %v439_v1 = vpop.permute.xlu0 %438 }
  0xf5   :  { %480 = vperm.xlu2 %615, %v756_v4  }
  0xf7   :  { %v1022_v17 = vpop.permute.xlu2 %324 }
  0xfb   :  { %616 = vset.pattern.permute.xlu1 %v722_v44  ;;  %v287_v33 = vpop.permute.xlu1 %286 }
  0xfc   :  { %v294_v4 = vsel %vm978_vm9, %v287_v33, %v275_v26  ;;  %491 = vperm.xlu1 %616, %v752_v2   ;;  %vm1101_vm9 = vcmp.eq.s32.totalorder %v374_v12, 1  ;;  %v431_v26 = vperm.slane %v430_v19, 0 }
  0xfd   :  { %617 = vset.pattern.permute.xlu2 %v722_v44  ;;  %v1039_v31 = vsel %vm1029_vm13, %v306_v24, %v294_v4  ;;  %v473_v20 = vpop.permute.xlu0 %472  ;;  %v468_v24 = vsel %vm467_vm8, 1, %v701_v0 }
  0xfe   :  { %495 = vperm.xlu2 %617, %v754_v3   ;;  %v332_v36 = vsel %vm1025_vm12, %v1022_v17, %v1039_v31  ;;  %v355_v3 = vperm.slane %v354_v39, 0  ;;  %v469_v30 = vperm.slane %v468_v24, 0 }
 0x100   :  { %v340_v37 = vpop.permute.xlu2 %339  ;;  %vm1054_vm0 = vcmp.eq.s32.totalorder %v355_v3, 1  ;;  %vm1134_vm2 = vcmp.eq.s32.totalorder %v469_v30, 1 }
 0x104   :  { %v302_v38 = vpop.permute.xlu1 %301 }
 0x105   :  { %v312_v2 = vsel %vm1029_vm13, %v302_v38, %v293_v13  ;;  %vm1118_vm13 = vcmp.eq.s32.totalorder %v431_v26, 1 }
 0x106   :  { %v500_v40 = vpop.permute.xlu0 %499 }
 0x109   :  { %v1052_v41 = vpop.permute.xlu2 %358 }
 0x10d   :  { %v321_v43 = vpop.permute.xlu1 %320 }
 0x10e   :  { %v331_v46 = vsel %vm1025_vm12, %v321_v43, %v312_v2 }
 0x10f   :  { %v1066_v28 = vsel %vm1058_vm1, %v340_v37, %v331_v46 }
 0x110   :  { %v369_v47 = vsel %vm1054_vm0, %v1052_v41, %v1066_v28 }
 0x111   :  { %v367_v48 = vpop.permute.xlu2 %366  ;;  %v388_v17 = vsel %vm1101_vm9, %v378_v49, %v369_v47 }
 0x115   :  { %v329_v50 = vpop.permute.xlu1 %328 }
 0x116   :  { %v333_v7 = vsel %vm1025_vm12, %v329_v50, %v314_v5 }
 0x11a   :  { %v386_v51 = vpop.permute.xlu2 %385 }
 0x11e   :  { %v348_v52 = vpop.permute.xlu1 %347 }
 0x11f   :  { %v352_v10 = vsel %vm1058_vm1, %v348_v52, %v333_v7 }
 0x120   :  { %v371_v16 = vsel %vm1054_vm0, %v367_v48, %v352_v10  ;;  %v351_v48 = vsel %vm1058_vm1, %v344_v56, %v332_v36 }
 0x121   :  { %v390_v18 = vsel %vm1101_vm9, %v386_v51, %v371_v16 }
 0x122   :  { %v409_v32 = vsel %vm1108_vm10, %v405_v61, %v390_v18 }
 0x123   :  { %v1072_v53 = vpop.permute.xlu2 %400 }
 0x127   :  { %v363_v55 = vpop.permute.xlu1 %362 }
 0x128   :  { %v370_v50 = vsel %vm1054_vm0, %v363_v55, %v351_v48 }
 0x12c   :  { %v420_v57 = vpop.permute.xlu2 %419 }
 0x130   :  { %v382_v58 = vpop.permute.xlu1 %381 }
 0x131   :  { %v389_v51 = vsel %vm1101_vm9, %v382_v58, %v370_v50 }
 0x132   :  { %v408_v54 = vsel %vm1108_vm10, %v1072_v53, %v389_v51 }
 0x133   :  { %v427_v34 = vsel %vm1114_vm11, %v420_v57, %v408_v54 }
 0x134   :  { %v446_v31 = vsel %vm1118_vm13, %v439_v1, %v427_v34 }
 0x135   :  { %v1074_v59 = vpop.permute.xlu2 %434 }
 0x139   :  { %v1076_v60 = vpop.permute.xlu1 %396 }
 0x13a   :  { %v407_v36 = vsel %vm1108_vm10, %v1076_v60, %v388_v17 }
 0x13e   :  { %v1078_v62 = vpop.permute.xlu2 %453 }
 0x142   :  { %v416_v63 = vpop.permute.xlu1 %415 }
 0x143   :  { %v426_v53 = vsel %vm1114_vm11, %v416_v63, %v407_v36 }
 0x144   :  { %v445_v47 = vsel %vm1118_vm13, %v1074_v59, %v426_v53 }
 0x145   :  { %v464_v56 = vsel %vm1124_vm14, %v1078_v62, %v445_v47 }
 0x146   :  { %v462_v11 = vpop.permute.xlu2 %461  ;;  %v483_v57 = vsel %vm1134_vm2, %v473_v20, %v464_v56 }
 0x14a   :  { %v424_v13 = vpop.permute.xlu1 %423 }
 0x14b   :  { %v428_v35 = vsel %vm1114_vm11, %v424_v13, %v409_v32 }
 0x14f   :  { %v481_v37 = vpop.permute.xlu2 %480 }
 0x153   :  { %v443_v4 = vpop.permute.xlu1 %442 }
 0x154   :  { %v447_v2 = vsel %vm1118_vm13, %v443_v4, %v428_v35 }
 0x155   :  { %v466_v42 = vsel %vm1124_vm14, %v462_v11, %v447_v2 }
 0x156   :  { %v485_v43 = vsel %vm1134_vm2, %v481_v37, %v466_v42 }
 0x157   :  { %v504_v46 = vsel %vm1130_vm15, %v500_v40, %v485_v43 }
 0x158   :  { %507 = vst [vmem:[#allocation7 + $0x10] sm:$0xff] %v504_v46  ;;  %v496_v45 = vpop.permute.xlu2 %495 }
 0x15c   :  { %v458_v52 = vpop.permute.xlu1 %457 }
 0x15d   :  { %v465_v44 = vsel %vm1124_vm14, %v458_v52, %v446_v31 }
 0x165   :  { %v477_v55 = vpop.permute.xlu1 %476 }
 0x166   :  { %v484_v41 = vsel %vm1134_vm2, %v477_v55, %v465_v44 }
 0x167   :  { %v503_v28 = vsel %vm1130_vm15, %v496_v45, %v484_v41 }
 0x168   :  { %506 = vst [vmem:[#allocation7 + $0x8] sm:$0xff] %v503_v28 }
 0x16e   :  { %v492_v58 = vpop.permute.xlu1 %491 }
 0x16f   :  { %v502_v49 = vsel %vm1130_vm15, %v492_v58, %v483_v57 }
 0x170   :  { %505 = vst [vmem:[#allocation7] sm:$0xff] %v502_v49 }
 0x171   :  { %520 = dma.vmem_to_hbm [thread:$0]  %s513_s1, 384, %s515_s23, [#allocation4], %s699_s19, %s699_s19, %s700_s20  }
 0x172   :  { %695 = dma.done.wait [#allocation4], 384  }
 0x173   :  { %696 = vsyncadd [#allocation4], 4294966912 }
 0x174   :  { %525 = vsyncpa [#allocation3], 1 }
 0x175   :  { %526 = vsyncpa [#allocation6], 1 }
 0x176   :  { %527 = vsyncpa [#allocation4], 1 }

</bundles_post_ra>
